<compile_context>
chip_gen: v5e
topology: v5e:2x2
jax: 0.10.0
libtpu: 0.0.40
codegen_flags: <defaults>
</compile_context>

<pallas_src>
import jax
import jax.numpy as jnp
from jax.experimental import pallas as pl
from jax.experimental.pallas import tpu as pltpu


_VMEM_LIMIT = 64 * 1024 * 1024  # generous scoped-VMEM limit for all calls


# ----------------------------- Pallas kernels ------------------------------ #

def make_fused_kernel(dhw, lam):
    """Single-pass SimAM on a (ct, DHW) channel-tile (spatial axis on lanes)."""
    inv_dhw = 1.0 / float(dhw)
    inv_n = 1.0 / float(dhw - 1)

    def kernel(x_ref, out_ref):
        x = x_ref[0]                                            # (ct, DHW)
        mu = jnp.sum(x, axis=1, keepdims=True) * inv_dhw        # (ct, 1)
        d2 = (x - mu) ** 2
        denom = 4.0 * (jnp.sum(d2, axis=1, keepdims=True) * inv_n + lam)
        inv = pl.reciprocal(denom, approx=False)                # (ct, 1)
        y = d2 * inv + 0.5
        out_ref[...] = (x * jax.nn.sigmoid(y))[None, :, :]

    return kernel


def _stats_kernel(x_ref, sum_ref, sq_ref):
    """Phase 1: accumulate per-channel sum and sum-of-squares over spatial tiles."""
    @pl.when(pl.program_id(2) == 0)
    def _():
        sum_ref[...] = jnp.zeros_like(sum_ref)
        sq_ref[...] = jnp.zeros_like(sq_ref)

    x = x_ref[0]                                                # (ct, ts)
    sum_ref[...] += jnp.sum(x, axis=1, keepdims=True)[None, :, :]
    sq_ref[...] += jnp.sum(x * x, axis=1, keepdims=True)[None, :, :]


def _apply_kernel(x_ref, mu_ref, inv_ref, out_ref):
    """Phase 2: apply the attention element-wise on a (ct, ts) tile."""
    x = x_ref[0]                                                # (ct, ts)
    d2 = (x - mu_ref[0]) ** 2
    y = d2 * inv_ref[0] + 0.5
    out_ref[...] = (x * jax.nn.sigmoid(y))[None, :, :]


# ------------------------------ JAX wrappers -------------------------------- #

def _pick_channel_tile(C):
    # 8 f32 rows fill the vreg sublanes; otherwise fall back to the full axis
    # (block == full array dim relaxes the (8,128) constraint).
    return 8 if (C % 8 == 0) else C


def _pick_spatial_tile(dhw, ct, budget_bytes):
    """Largest lane-dense (multiple of 128) tile dividing DHW within budget."""
    max_elems = budget_bytes // (ct * 4)
    t = (max_elems // 128) * 128
    while t >= 128:
        if dhw % t == 0:
            return t
        t -= 128
    return None


def _simam_fused(x3, ct, lam):
    B, C, DHW = x3.shape
    kernel = make_fused_kernel(DHW, lam)
    return pl.pallas_call(
        kernel,
        out_shape=jax.ShapeDtypeStruct((B, C, DHW), x3.dtype),
        grid_spec=pltpu.PrefetchScalarGridSpec(
            num_scalar_prefetch=0,
            grid=(B, C // ct),
            in_specs=[pl.BlockSpec((1, ct, DHW), lambda b, c: (b, c, 0))],
            out_specs=pl.BlockSpec((1, ct, DHW), lambda b, c: (b, c, 0)),
        ),
        compiler_params=pltpu.CompilerParams(
            dimension_semantics=("parallel", "parallel"),
            vmem_limit_bytes=_VMEM_LIMIT),
    )(x3)


def _simam_two_phase(x3, ct, ts, lam):
    B, C, DHW = x3.shape
    n_c = C // ct
    n_s = DHW // ts

    # ---- Phase 1: per-channel sum / sum-of-squares (reduction over tiles) ----
    s1, s2 = pl.pallas_call(
        _stats_kernel,
        out_shape=(jax.ShapeDtypeStruct((B, C, 1), jnp.float32),
                   jax.ShapeDtypeStruct((B, C, 1), jnp.float32)),
        grid_spec=pltpu.PrefetchScalarGridSpec(
            num_scalar_prefetch=0,
            grid=(B, n_c, n_s),
            in_specs=[pl.BlockSpec((1, ct, ts), lambda b, c, s: (b, c, s))],
            out_specs=[pl.BlockSpec((1, ct, 1), lambda b, c, s: (b, c, 0)),
                       pl.BlockSpec((1, ct, 1), lambda b, c, s: (b, c, 0))],
        ),
        compiler_params=pltpu.CompilerParams(
            dimension_semantics=("parallel", "parallel", "arbitrary"),
            vmem_limit_bytes=_VMEM_LIMIT),
    )(x3)

    # Tiny (B, C, 1) math done in plain JAX between the two calls.
    N = float(DHW)
    mu = s1 / N
    d2_sum = jnp.maximum(s2 - N * mu * mu, 0.0)          # = sum((x - mu)^2)
    inv = 1.0 / (4.0 * (d2_sum / (N - 1.0) + lam))

    # ---- Phase 2: apply attention, fully parallel tiled grid ----
    out = pl.pallas_call(
        _apply_kernel,
        out_shape=jax.ShapeDtypeStruct((B, C, DHW), x3.dtype),
        grid_spec=pltpu.PrefetchScalarGridSpec(
            num_scalar_prefetch=0,
            grid=(B, n_c, n_s),
            in_specs=[pl.BlockSpec((1, ct, ts), lambda b, c, s: (b, c, s)),
                      pl.BlockSpec((1, ct, 1), lambda b, c, s: (b, c, 0)),
                      pl.BlockSpec((1, ct, 1), lambda b, c, s: (b, c, 0))],
            out_specs=pl.BlockSpec((1, ct, ts), lambda b, c, s: (b, c, s)),
        ),
        compiler_params=pltpu.CompilerParams(
            dimension_semantics=("parallel", "parallel", "parallel"),
            vmem_limit_bytes=_VMEM_LIMIT),
    )(x3, mu, inv)
    return out


def simam(x, e_lambda=1e-4, max_block_bytes=2 * 1024 * 1024):
    """SimAM forward.  x: (B, C, D, H, W) float32 -> same shape."""
    B, C, D, H, W = x.shape
    DHW = D * H * W
    x3 = x.reshape(B, C, DHW)          # free reshape: trailing dims collapse
    ct = _pick_channel_tile(C)

    if ct * DHW * 4 <= max_block_bytes:
        out = _simam_fused(x3, ct, e_lambda)
    else:
        ts = _pick_spatial_tile(DHW, ct, max_block_bytes)
        if ts is None:
            # TODO(synk): DHW has no lane-dense (multiple-of-128) divisor within
            # budget; fall back to the single-pass whole-row kernel.
            out = _simam_fused(x3, ct, e_lambda)
        else:
            out = _simam_two_phase(x3, ct, ts, e_lambda)

    return out.reshape(B, C, D, H, W)  # free reshape back to NCDHW


# --------------------------- Pure-JAX reference ----------------------------- #

def _simam_ref(x, lam):
    _, _, d, h, w = x.shape
    n = d * h * w - 1
    mu = x.mean(axis=(2, 3, 4), keepdims=True)
    d2 = (x - mu) ** 2
    y = d2 / (4.0 * (d2.sum(axis=(2, 3, 4), keepdims=True) / n + lam)) + 0.5
    return x * jax.nn.sigmoid(y)


# ---------------------------------- main ------------------------------------ #

if __name__ == "__main__":
    e_lambda = 1e-4
    key = jax.random.PRNGKey(0)
    k1, k2 = jax.random.split(key)

    # Case 1: C not a multiple of 8 (full-channel block), fused single-pass path.
    B, C, D, H, W = 2, 4, 16, 16, 16
    x = jax.random.normal(k1, (B, C, D, H, W), dtype=jnp.float32)
    out = jax.block_until_ready(simam(x, e_lambda))
    ref = _simam_ref(x, e_lambda)
    assert out.shape == (B, C, D, H, W)
    assert jnp.allclose(out, ref, atol=1e-4, rtol=1e-4), \
        f"mismatch (fused path): max err {float(jnp.max(jnp.abs(out - ref)))}"

    # Case 2: force the tiled two-phase path on the same input (small budget).
    out_t = jax.block_until_ready(simam(x, e_lambda, max_block_bytes=16 * 1024))
    assert jnp.allclose(out_t, ref, atol=1e-4, rtol=1e-4), \
        f"mismatch (two-phase path): max err {float(jnp.max(jnp.abs(out_t - ref)))}"

    # Case 3: C multiple of 8 (8-row channel tiles), both paths.
    B2, C2, D2, H2, W2 = 2, 8, 8, 8, 8
    x2 = jax.random.normal(k2, (B2, C2, D2, H2, W2), dtype=jnp.float32)
    ref2 = _simam_ref(x2, e_lambda)
    out2 = jax.block_until_ready(simam(x2, e_lambda))
    assert jnp.allclose(out2, ref2, atol=1e-4, rtol=1e-4), \
        f"mismatch (fused, C=8): max err {float(jnp.max(jnp.abs(out2 - ref2)))}"
    out2_t = jax.block_until_ready(simam(x2, e_lambda, max_block_bytes=8 * 1024))
    assert jnp.allclose(out2_t, ref2, atol=1e-4, rtol=1e-4), \
        f"mismatch (two-phase, C=8): max err {float(jnp.max(jnp.abs(out2_t - ref2)))}"

    print("KERNEL_OK")
</pallas_src>

<mosaic_0001>
module attributes {stable_mosaic.version = 11 : i64} {
  func.func @kernel(%arg0: i32, %arg1: i32, %arg2: memref<1x4x4096xf32, #tpu.memory_space<vmem>>, %arg3: memref<1x4x4096xf32, #tpu.memory_space<vmem>>) attributes {dimension_semantics = [#tpu.dimension_semantics<parallel>, #tpu.dimension_semantics<parallel>], iteration_bounds = array<i64: 2, 1>, scalar_prefetch = 0 : i64, scratch_operands = 0 : i64, tpu.core_type = #tpu.core_type<tc>, window_params = [{transform_indices = @transform_0, window_bounds = array<i64: 1, 4, 4096>}, {transform_indices = @transform_1, window_bounds = array<i64: 1, 4, 4096>}]} {
    %c0 = arith.constant 0 : index
    %c0_0 = arith.constant 0 : index
    %c0_1 = arith.constant 0 : index
    %0 = vector.load %arg2[%c0, %c0_0, %c0_1] : memref<1x4x4096xf32, #tpu.memory_space<vmem>>, vector<1x4x4096xf32>
    %1 = vector.shape_cast %0 : vector<1x4x4096xf32> to vector<4x4096xf32>
    %cst = arith.constant dense<0.000000e+00> : vector<4xf32>
    %2 = vector.multi_reduction <add>, %1, %cst [1] : vector<4x4096xf32> to vector<4xf32>
    %3 = vector.shape_cast %2 : vector<4xf32> to vector<4x1xf32>
    %cst_2 = arith.constant 2.44140625E-4 : f32
    %4 = vector.broadcast %cst_2 : f32 to vector<4x1xf32>
    %5 = arith.mulf %3, %4 : vector<4x1xf32>
    %6 = vector.broadcast %5 : vector<4x1xf32> to vector<4x4096xf32>
    %7 = arith.subf %1, %6 : vector<4x4096xf32>
    %8 = arith.mulf %7, %7 : vector<4x4096xf32>
    %cst_3 = arith.constant dense<0.000000e+00> : vector<4xf32>
    %9 = vector.multi_reduction <add>, %8, %cst_3 [1] : vector<4x4096xf32> to vector<4xf32>
    %10 = vector.shape_cast %9 : vector<4xf32> to vector<4x1xf32>
    %cst_4 = arith.constant 2.44200259E-4 : f32
    %11 = vector.broadcast %cst_4 : f32 to vector<4x1xf32>
    %12 = arith.mulf %10, %11 : vector<4x1xf32>
    %cst_5 = arith.constant 9.99999974E-5 : f32
    %13 = vector.broadcast %cst_5 : f32 to vector<4x1xf32>
    %14 = arith.addf %12, %13 : vector<4x1xf32>
    %cst_6 = arith.constant 4.000000e+00 : f32
    %15 = vector.broadcast %cst_6 : f32 to vector<4x1xf32>
    %16 = arith.mulf %15, %14 : vector<4x1xf32>
    %17 = tpu.reciprocal %16 : vector<4x1xf32> -> vector<4x1xf32>
    %18 = vector.broadcast %17 : vector<4x1xf32> to vector<4x4096xf32>
    %19 = arith.mulf %8, %18 : vector<4x4096xf32>
    %cst_7 = arith.constant 5.000000e-01 : f32
    %20 = vector.broadcast %cst_7 : f32 to vector<4x4096xf32>
    %21 = arith.addf %19, %20 : vector<4x4096xf32>
    %22 = arith.negf %21 : vector<4x4096xf32>
    %23 = math.exp %22 : vector<4x4096xf32>
    %cst_8 = arith.constant 1.000000e+00 : f32
    %24 = vector.broadcast %cst_8 : f32 to vector<4x4096xf32>
    %25 = arith.addf %24, %23 : vector<4x4096xf32>
    %26 = arith.divf %24, %25 : vector<4x4096xf32>
    %27 = arith.mulf %1, %26 : vector<4x4096xf32>
    %28 = vector.shape_cast %27 : vector<4x4096xf32> to vector<1x4x4096xf32>
    %c0_9 = arith.constant 0 : index
    %c0_10 = arith.constant 0 : index
    %c0_11 = arith.constant 0 : index
    %29 = vector.load %arg3[%c0_9, %c0_10, %c0_11] : memref<1x4x4096xf32, #tpu.memory_space<vmem>>, vector<1x4x4096xf32>
    tpu.vector_store %arg3[%c0_9, %c0_10, %c0_11], %28 {strides = array<i32>} : memref<1x4x4096xf32, #tpu.memory_space<vmem>>, vector<1x4x4096xf32>,
    return
  }
  func.func @transform_0(%arg0: i32, %arg1: i32) -> (i32, i32, i32) {
    %c0_i32 = arith.constant 0 : i32
    %c0_i32_0 = arith.constant 0 : i32
    return %arg0, %arg1, %c0_i32 : i32, i32, i32
  }
  func.func @transform_1(%arg0: i32, %arg1: i32) -> (i32, i32, i32) {
    %c0_i32 = arith.constant 0 : i32
    %c0_i32_0 = arith.constant 0 : i32
    return %arg0, %arg1, %c0_i32 : i32, i32, i32
  }
}

</mosaic_0001>

<bundles_post_ra>
// kernel: tpu_custom_call.1
= control target key start
LH: loop header
LB: loop body
LE: loop exit
PB: predicated region body
PF: predicated region fallthrough
CT: control target
= control target key end

     0   :  { %6 = vsyncpa [#allocation3], 0  ;;  %s2203_s0 = inlined_call_operand.hbm [shape: f32[2,4,4096], index: 0, kind: input, shape index: {}]   ;;  %s2204_s1 = inlined_call_operand.hbm [shape: f32[2,4,4096], index: 1, kind: output, shape index: {}]  }
   0x1   :  { %8 = vsyncpa [#allocation3 + $0x1], 0 }
   0x2   :  { %9 = vsyncpa [#allocation4], 0 }
   0x3   :  { %11 = vsyncpa [#allocation4 + $0x1], 0  ;;  %s1318_s6 = smov 0   ;;  %s1320_s7 = smov 0  }
   0x4   :  { %s1322_s8 = smov 0   ;;  %s1324_s9 = smov 0  }
   0x5   :  { %s1326_s10 = smov 0   ;;  %s1328_s11 = smov 0  }
   0x6 LB: > { %s1031_s12 = sadd.s32 4294967295, %s1305_s11   ;;  %s1032_s13 = sadd.s32 4294967294, %s1305_s11   ;;  %s1305_s11 = sphi %s1328_s11, %s17_s11   ;;  %s1301_s10 = sphi %s1326_s10, %s2276_s10   ;;  %s1297_s9 = sphi %s1324_s9, %s2275_s9   ;;  %s1293_s8 = sphi %s1322_s8, %s2274_s8   ;;  %s1289_s7 = sphi %s1320_s7, %s2273_s7   ;;  %s1285_s6 = sphi %s1318_s6, %s2272_s6  }
   0x7   : > { %s29_s14 = sadd.s32 1, %s1301_s10  ;;  %s38_s15 = sadd.s32 1, %s1293_s8 }
   0x8   : > { %p31_p0 = scmp.ge.s32.totalorder %s29_s14, 2  ;;  %p45_p1 = scmp.ne.s32.totalorder %s1293_s8, %s1289_s7 }
   0x9   : > { %p46_p2 = scmp.eq.s32.totalorder %s1305_s11, 0  ;;  %p51_p3 = scmp.ne.s32.totalorder %s1289_s7, %s1285_s6 }
   0xa   : > { %s2278_s14 = smov (%p31_p0, %s29_s14), 0  ;;  %p52_p5 = scmp.eq.s32.totalorder %s1031_s12, 0 }
   0xb   : > { %p1359_p4 = por %p46_p2, %p45_p1  ;;  %s33_s17 = ssub.s32 %s1301_s10, %s2278_s14 }
   0xc   : > { %p77_p6 = scmp.eq.s32.totalorder %s1031_s12, 1  ;;  %p36_p7 = scmp.eq.s32.totalorder %s33_s17, 0 }
   0xd   : > { %p1365_p8 = por %p52_p5, %p51_p3  ;;  %p83_p10 = scmp.eq.s32.totalorder %s1032_s13, 1 }
   0xe   : > { %p1369_p9 = por %p77_p6, %p45_p1  ;;  %p1034_p12 = scmp.ge.s32.totalorder %s1305_s11, 2 }
   0xf   : > { %s1374_s20 = scalar_select %p36_p7, %s1293_s8, %s38_s15  }
  0x10   : > { %p1376_p11 = por %p83_p10, %p51_p3  ;;  %p1076_p13 = scmp.lt.s32.totalorder %s1305_s11, 2 }
  0x11   : > { %s103_s22 = sand.u32 1, %s1293_s8   ;;  %s1062_s24 = sshll.u32 %s1301_s10, 7 }
  0x12   : > { %s1035_s23 = sshll.u32 %s103_s22, 7  ;;  %s114_s27 = scalar_lea.hbm %s2203_s0, %s1062_s24 }
  0x13   : > { %s107_s28 = scalar_lea.vmem [#allocation2], %s1035_s23  ;;  %s116_s30 = sshll.u32 %s114_s27, 4  ;;  %s117_s30 = int_to_ptr.hbm [resolvable:$true] %s116_s30 }
  0x14   : > { %s118_s29 = sshll.u32 %s107_s28, 4  ;;  %p1069_p0 = pnand %p1076_p13, %p1359_p4  ;;  %s119_s29 = int_to_ptr.vmem [resolvable:$true] %s118_s29 }
  0x15   : > { %p1038_p1 = scmp.ge.s32.totalorder %s1305_s11, 1  ;;  %p123_p2 = scmp.lt.s32.totalorder %s1305_s11, 3 }
  0x16   : > { %s104_s2 = scalar_lea.sflag [#allocation3], %s103_s22 }
  0x17   : > { %1071 = dma.hbm_to_vmem [thread:$0]  (!%p1069_p0), %s117_s30, 2048, %s119_s29, %s104_s2  }
  0x18   : > { %p124_p3 = pnand %p1038_p1, %p123_p2 }
  0x1a   : > { %127 = sbr.rel (%p124_p3) target bundleno = 533 (0x215), region = 24 }
  0x1f   : > { %s1392_s3 = sand.u32 1, %s1289_s7  }
  0x20   : > { %s1039_s4 = sshll.u32 %s1392_s3, 7  ;;  %s130_s5 = scalar_lea.sflag [#allocation3], %s1392_s3 }
  0x21   : > { %s1398_s12 = scalar_lea.vmem [#allocation2], %s1039_s4 }
  0x22   : > { %1276 = dma.done.wait (%p1365_p8), %s130_s5, 2048  }
  0x23   : > { %1278 = vsyncadd (%p1365_p8), %s130_s5, 4294965248  ;;  %v1405_v0 = vld [vmem:[%s1398_s12] sm:$0xff]  ;;  %v1408_v1 = vld [vmem:[%s1398_s12 + $0x8] sm:$0xff]  ;;  %vm268_vm0 = vcmask 1043456   ;;  %s2087_s13 = scalar_lea.vmem [#allocation5], %s1039_s4  ;;  %s1063_s15 = sshll.u32 %s1297_s9, 7 }
  0x24   : > { %v1411_v2 = vld [vmem:[%s1398_s12 + $0x10] sm:$0xff]  ;;  %v1414_v3 = vld [vmem:[%s1398_s12 + $0x18] sm:$0xff]  ;;  %185 = vst [vmem:[#allocation1] ss:$2 sm:$0xff] %v1405_v0  ;;  %v1421_v4 = vld [vmem:[%s1398_s12 + $0x20] sm:$0xff]  ;;  %s942_s17 = scalar_lea.hbm %s2204_s1, %s1063_s15  ;;  %s944_s18 = sshll.u32 %s2087_s13, 4  ;;  %s945_s18 = int_to_ptr.vmem [resolvable:$true] %s944_s18 }
  0x25   : > { %187 = vst [vmem:[#allocation1 + $0x10] ss:$2 sm:$0xff] %v1408_v1  ;;  %v1424_v8 = vld [vmem:[%s1398_s12 + $0x28] sm:$0xff]  ;;  %v1427_v9 = vld [vmem:[%s1398_s12 + $0x30] sm:$0xff]  ;;  %v1430_v13 = vld [vmem:[%s1398_s12 + $0x38] sm:$0xff]  ;;  %s946_s22 = sshll.u32 %s942_s17, 4  ;;  %s947_s22 = int_to_ptr.hbm [resolvable:$true] %s946_s22 }
  0x26   : > { %189 = vst [vmem:[#allocation1 + $0x20] ss:$2 sm:$0xff] %v1411_v2  ;;  %v1443_v25 = vld [vmem:[%s1398_s12 + $0x40] sm:$0xff]  ;;  %v1446_v26 = vld [vmem:[%s1398_s12 + $0x48] sm:$0xff]  ;;  %v1449_v28 = vld [vmem:[%s1398_s12 + $0x50] sm:$0xff]  ;;  %s929_s23 = scalar_lea.sflag [#allocation4], %s1392_s3 }
  0x27   : > { %191 = vst [vmem:[#allocation1 + $0x30] ss:$2 sm:$0xff] %v1414_v3  ;;  %v1454_v37 = vld [vmem:[%s1398_s12 + $0x58] sm:$0xff]  ;;  %v1464_v48 = vld [vmem:[%s1398_s12 + $0x60] sm:$0xff]  ;;  %v1468_v50 = vld [vmem:[%s1398_s12 + $0x68] sm:$0xff]  ;;  %s1237_s24 = sshra.s32 %s947_s22, 4  ;;  %s1238_s24 = int_to_ptr.hbm [resolvable:$true] %s1237_s24 }
  0x28   : > { %v1471_v51 = vld [vmem:[%s1398_s12 + $0x70] sm:$0xff]  ;;  %v1475_v55 = vld [vmem:[%s1398_s12 + $0x78] sm:$0xff]  ;;  %s1239_s25 = scalar_lea.hbm %s1238_s24, 128  ;;  %s1243_s28 = scalar_lea.hbm %s2204_s1, 256 }
  0x29   : > { %2210 = vst [vmem:[#allocation8_spill] sm:$0xff] %v1475_v55  ;;  %p1240_p4 = scmp.ne.s32.totalorder %s1238_s24, %s1239_s25  ;;  %p1244_p7 = scmp.lt.s32.totalorder %s1238_s24, %s2204_s1 }
  0x2a   : > { %p1245_p8 = scmp.lt.s32.totalorder %s1243_s28, %s1239_s25 }
  0x2b   : > { %v192_v5 = vld.sshfl [vmem:[#allocation1] sm:$0xff pattern:$0x75316420]  ;;  %v193_v6 = vld.sshfl [vmem:[#allocation1 + $0x8] sm:$0xff pattern:$0x75316420]  ;;  %p1241_p5 = pnand %p1240_p4, %p1369_p9 }
  0x2c   : > { %v194_v7 = vld.sshfl [vmem:[#allocation1 + $0x10] sm:$0xff pattern:$0x75316420]  ;;  %v195_v10 = vld.sshfl [vmem:[#allocation1 + $0x18] sm:$0xff pattern:$0x75316420]  ;;  %p1246_p10 = por %p1245_p8, %p1244_p7 }
  0x2d   : > { %v196_v11 = vld.sshfl [vmem:[#allocation1 + $0x20] sm:$0xff pattern:$0x75316420]  ;;  %v197_v12 = vld.sshfl [vmem:[#allocation1 + $0x28] sm:$0xff pattern:$0x75316420]  ;;  %p1242_p6 = pneg %p1241_p5 }
  0x2e   : > { %200 = vst [vmem:[#allocation1] ss:$2 sm:$0xff] %v1421_v4  ;;  %v269_v14 = vsel %vm268_vm0, %v192_v5, 0.0  ;;  %v270_v15 = vsel %vm268_vm0, %v193_v6, 0.0  ;;  %v272_v16 = vsel %vm268_vm0, %v194_v7, 0.0  ;;  %v274_v20 = vsel %vm268_vm0, %v195_v10, 0.0 }
  0x2f   : > { %v198_v17 = vld.sshfl [vmem:[#allocation1 + $0x30] sm:$0xff pattern:$0x75316420]  ;;  %201 = vst [vmem:[#allocation1 + $0x10] ss:$2 sm:$0xff] %v1424_v8  ;;  %v271_v18 = vadd.f32 %v270_v15, %v269_v14  ;;  %v276_v22 = vsel %vm268_vm0, %v196_v11, 0.0  ;;  %p1247_p13 = pnand %p1246_p10, %p1242_p6 }
  0x30   : > { %v199_v19 = vld.sshfl [vmem:[#allocation1 + $0x38] sm:$0xff pattern:$0x75316420]  ;;  %202 = vst [vmem:[#allocation1 + $0x20] ss:$2 sm:$0xff] %v1427_v9  ;;  %v278_v24 = vsel %vm268_vm0, %v197_v12, 0.0 }
  0x31   : > { %203 = vst [vmem:[#allocation1 + $0x30] ss:$2 sm:$0xff] %v1430_v13  ;;  %v273_v21 = vadd.f32 %v272_v16, %v271_v18  ;;  %v280_v30 = vsel %vm268_vm0, %v198_v17, 0.0  ;;  %v282_v31 = vsel %vm268_vm0, %v199_v19, 0.0 }
  0x33   : > { %v275_v23 = vadd.f32 %v274_v20, %v273_v21 }
  0x35   : > { %v277_v27 = vadd.f32 %v276_v22, %v275_v23  ;;  %v204_v29 = vld.sshfl [vmem:[#allocation1] sm:$0xff pattern:$0x75316420]  ;;  %v205_v32 = vld.sshfl [vmem:[#allocation1 + $0x8] sm:$0xff pattern:$0x75316420] }
  0x36   : > { %v206_v33 = vld.sshfl [vmem:[#allocation1 + $0x10] sm:$0xff pattern:$0x75316420]  ;;  %v207_v35 = vld.sshfl [vmem:[#allocation1 + $0x18] sm:$0xff pattern:$0x75316420] }
  0x37   : > { %v279_v34 = vadd.f32 %v278_v24, %v277_v27  ;;  %v208_v36 = vld.sshfl [vmem:[#allocation1 + $0x20] sm:$0xff pattern:$0x75316420]  ;;  %v209_v38 = vld.sshfl [vmem:[#allocation1 + $0x28] sm:$0xff pattern:$0x75316420] }
  0x38   : > { %212 = vst [vmem:[#allocation1] ss:$2 sm:$0xff] %v1443_v25  ;;  %v210_v40 = vld.sshfl [vmem:[#allocation1 + $0x30] sm:$0xff pattern:$0x75316420]  ;;  %v284_v41 = vsel %vm268_vm0, %v204_v29, 0.0 }
  0x39   : > { %v281_v39 = vadd.f32 %v280_v30, %v279_v34  ;;  %213 = vst [vmem:[#allocation1 + $0x10] ss:$2 sm:$0xff] %v1446_v26  ;;  %v211_v42 = vld.sshfl [vmem:[#allocation1 + $0x38] sm:$0xff pattern:$0x75316420]  ;;  %v286_v44 = vsel %vm268_vm0, %v205_v32, 0.0 }
  0x3a   : > { %214 = vst [vmem:[#allocation1 + $0x20] ss:$2 sm:$0xff] %v1449_v28  ;;  %v288_v46 = vsel %vm268_vm0, %v206_v33, 0.0  ;;  %v290_v49 = vsel %vm268_vm0, %v207_v35, 0.0  ;;  %v292_v54 = vsel %vm268_vm0, %v208_v36, 0.0  ;;  %v294_v62 = vsel %vm268_vm0, %v209_v38, 0.0 }
  0x3b   : > { %v283_v43 = vadd.f32 %v282_v31, %v281_v39  ;;  %215 = vst [vmem:[#allocation1 + $0x30] ss:$2 sm:$0xff] %v1454_v37  ;;  %v296_v7 = vsel %vm268_vm0, %v210_v40, 0.0  ;;  %v298_v11 = vsel %vm268_vm0, %v211_v42, 0.0 }
  0x3d   : > { %v285_v45 = vadd.f32 %v284_v41, %v283_v43 }
  0x3f   : > { %v287_v47 = vadd.f32 %v286_v44, %v285_v45  ;;  %v216_v52 = vld.sshfl [vmem:[#allocation1] sm:$0xff pattern:$0x75316420]  ;;  %v217_v56 = vld.sshfl [vmem:[#allocation1 + $0x8] sm:$0xff pattern:$0x75316420] }
  0x40   : > { %v218_v57 = vld.sshfl [vmem:[#allocation1 + $0x10] sm:$0xff pattern:$0x75316420]  ;;  %v219_v58 = vld.sshfl [vmem:[#allocation1 + $0x18] sm:$0xff pattern:$0x75316420] }
  0x41   : > { %v289_v53 = vadd.f32 %v288_v46, %v287_v47  ;;  %v220_v59 = vld.sshfl [vmem:[#allocation1 + $0x20] sm:$0xff pattern:$0x75316420]  ;;  %v221_v61 = vld.sshfl [vmem:[#allocation1 + $0x28] sm:$0xff pattern:$0x75316420] }
  0x42   : > { %224 = vst [vmem:[#allocation1] ss:$2 sm:$0xff] %v1464_v48  ;;  %v222_v63 = vld.sshfl [vmem:[#allocation1 + $0x30] sm:$0xff pattern:$0x75316420]  ;;  %v300_v14 = vsel %vm268_vm0, %v216_v52, 0.0 }
  0x43   : > { %v291_v60 = vadd.f32 %v290_v49, %v289_v53  ;;  %225 = vst [vmem:[#allocation1 + $0x10] ss:$2 sm:$0xff] %v1468_v50  ;;  %v223_v6 = vld.sshfl [vmem:[#allocation1 + $0x38] sm:$0xff pattern:$0x75316420]  ;;  %v302_v16 = vsel %vm268_vm0, %v217_v56, 0.0 }
  0x44   : > { %226 = vst [vmem:[#allocation1 + $0x20] ss:$2 sm:$0xff] %v1471_v51  ;;  %v304_v18 = vsel %vm268_vm0, %v218_v57, 0.0  ;;  %v306_v20 = vsel %vm268_vm0, %v219_v58, 0.0  ;;  %v308_v22 = vsel %vm268_vm0, %v220_v59, 0.0  ;;  %v310_v24 = vsel %vm268_vm0, %v221_v61, 0.0 }
  0x45   : > { %v293_v5 = vadd.f32 %v292_v54, %v291_v60  ;;  %227 = vst [vmem:[#allocation1 + $0x30] ss:$2 sm:$0xff] %v1475_v55  ;;  %v312_v29 = vsel %vm268_vm0, %v222_v63, 0.0  ;;  %v314_v32 = vsel %vm268_vm0, %v223_v6, 0.0  ;;  %v1307_v63 = vmov 839922192  }
  0x47   : > { %v295_v10 = vadd.f32 %v294_v62, %v293_v5  ;;  %v1500_v5 = vunpack.c.l.s4 %v1307_v63 }
  0x49   : > { %v297_v12 = vadd.f32 %v296_v7, %v295_v10  ;;  %v228_v30 = vld.sshfl [vmem:[#allocation1] sm:$0xff pattern:$0x75316420]  ;;  %v229_v33 = vld.sshfl [vmem:[#allocation1 + $0x8] sm:$0xff pattern:$0x75316420]  ;;  %v338_v6 = vunpack.c.0.s8 %v1500_v5 }
  0x4a   : > { %v316_v35 = vsel %vm268_vm0, %v228_v30, 0.0  ;;  %v230_v36 = vld.sshfl [vmem:[#allocation1 + $0x10] sm:$0xff pattern:$0x75316420]  ;;  %v318_v39 = vsel %vm268_vm0, %v229_v33, 0.0 }
  0x4b   : > { %v299_v15 = vadd.f32 %v298_v11, %v297_v12  ;;  %v231_v40 = vld.sshfl [vmem:[#allocation1 + $0x18] sm:$0xff pattern:$0x75316420]  ;;  %v320_v42 = vsel %vm268_vm0, %v230_v36, 0.0 }
  0x4c   : > { %v232_v43 = vld.sshfl [vmem:[#allocation1 + $0x20] sm:$0xff pattern:$0x75316420]  ;;  %v322_v45 = vsel %vm268_vm0, %v231_v40, 0.0 }
  0x4d   : > { %v301_v17 = vadd.f32 %v300_v14, %v299_v15  ;;  %v233_v46 = vld.sshfl [vmem:[#allocation1 + $0x28] sm:$0xff pattern:$0x75316420]  ;;  %v324_v49 = vsel %vm268_vm0, %v232_v43, 0.0 }
  0x4e   : > { %v234_v52 = vld.sshfl [vmem:[#allocation1 + $0x30] sm:$0xff pattern:$0x75316420]  ;;  %v326_v54 = vsel %vm268_vm0, %v233_v46, 0.0 }
  0x4f   : > { %v303_v19 = vadd.f32 %v302_v16, %v301_v17  ;;  %v235_v56 = vld.sshfl [vmem:[#allocation1 + $0x38] sm:$0xff pattern:$0x75316420]  ;;  %v328_v58 = vsel %vm268_vm0, %v234_v52, 0.0 }
  0x50   : > { %v330_v60 = vsel %vm268_vm0, %v235_v56, 0.0 }
  0x51   : > { %v305_v21 = vadd.f32 %v304_v18, %v303_v19 }
  0x53   : > { %v307_v23 = vadd.f32 %v306_v20, %v305_v21 }
  0x55   : > { %v309_v27 = vadd.f32 %v308_v22, %v307_v23 }
  0x57   : > { %v311_v31 = vadd.f32 %v310_v24, %v309_v27 }
  0x59   : > { %v313_v34 = vadd.f32 %v312_v29, %v311_v31 }
  0x5b   : > { %v315_v38 = vadd.f32 %v314_v32, %v313_v34 }
  0x5d   : > { %v317_v41 = vadd.f32 %v316_v35, %v315_v38 }
  0x5f   : > { %v319_v44 = vadd.f32 %v318_v39, %v317_v41 }
  0x61   : > { %v321_v47 = vadd.f32 %v320_v42, %v319_v44 }
  0x63   : > { %v323_v53 = vadd.f32 %v322_v45, %v321_v47 }
  0x65   : > { %v325_v57 = vadd.f32 %v324_v49, %v323_v53 }
  0x67   : > { %v327_v59 = vadd.f32 %v326_v54, %v325_v57 }
  0x69   : > { %v329_v61 = vadd.f32 %v328_v58, %v327_v59 }
  0x6b   : > { %v331_v62 = vadd.f32 %v330_v60, %v329_v61 }
  0x6d   : > { %332 = vadd.xlane.f32.xlu0 %v331_v62 }
  0xe0   : > { %v333_v7 = vpop.xlane.xlu0 %332 }
  0xe1   : > { %v334_v10 = vmul.f32 0.00024414063, %v333_v7 }
  0xe3   : > { %v1505_v11 = vperm.slane %v334_v10, %v338_v6 }
  0xe5   : > { %v341_v12 = vsub.f32 %v1405_v0, %v1505_v11  ;;  %v342_v14 = vsub.f32 %v1408_v1, %v1505_v11  ;;  %v343_v15 = vsub.f32 %v1411_v2, %v1505_v11  ;;  %v344_v16 = vsub.f32 %v1414_v3, %v1505_v11 }
  0xe6   : > { %v345_v21 = vsub.f32 %v1421_v4, %v1505_v11  ;;  %v346_v22 = vsub.f32 %v1424_v8, %v1505_v11  ;;  %v347_v23 = vsub.f32 %v1427_v9, %v1505_v11  ;;  %v348_v29 = vsub.f32 %v1430_v13, %v1505_v11 }
  0xe7   : > { %v1515_v17 = vmul.f32 %v341_v12, %v341_v12  ;;  %v1517_v18 = vmul.f32 %v342_v14, %v342_v14  ;;  %v1519_v19 = vmul.f32 %v343_v15, %v343_v15  ;;  %v1521_v20 = vmul.f32 %v344_v16, %v344_v16 }
  0xe8   : > { %v1535_v32 = vmul.f32 %v345_v21, %v345_v21  ;;  %v1537_v35 = vmul.f32 %v346_v22, %v346_v22  ;;  %v1539_v39 = vmul.f32 %v347_v23, %v347_v23  ;;  %v1544_v42 = vmul.f32 %v348_v29, %v348_v29 }
  0xe9   : > { %389 = vst [vmem:[#allocation1] ss:$2 sm:$0xff] %v1515_v17  ;;  %v349_v47 = vsub.f32 %v1443_v25, %v1505_v11  ;;  %v350_v52 = vsub.f32 %v1446_v26, %v1505_v11  ;;  %v351_v54 = vsub.f32 %v1449_v28, %v1505_v11  ;;  %v352_v60 = vsub.f32 %v1454_v37, %v1505_v11 }
  0xea   : > { %391 = vst [vmem:[#allocation1 + $0x10] ss:$2 sm:$0xff] %v1517_v18 }
  0xeb   : > { %393 = vst [vmem:[#allocation1 + $0x20] ss:$2 sm:$0xff] %v1519_v19  ;;  %v1562_v63 = vmul.f32 %v349_v47, %v349_v47  ;;  %v1564_v14 = vmul.f32 %v350_v52, %v350_v52  ;;  %v1566_v21 = vmul.f32 %v351_v54, %v351_v54 }
  0xec   : > { %395 = vst [vmem:[#allocation1 + $0x30] ss:$2 sm:$0xff] %v1521_v20 }
  0xf0   : > { %v396_v24 = vld.sshfl [vmem:[#allocation1] sm:$0xff pattern:$0x75316420]  ;;  %v397_v27 = vld.sshfl [vmem:[#allocation1 + $0x8] sm:$0xff pattern:$0x75316420] }
  0xf1   : > { %v398_v30 = vld.sshfl [vmem:[#allocation1 + $0x10] sm:$0xff pattern:$0x75316420]  ;;  %v399_v31 = vld.sshfl [vmem:[#allocation1 + $0x18] sm:$0xff pattern:$0x75316420] }
  0xf2   : > { %v400_v33 = vld.sshfl [vmem:[#allocation1 + $0x20] sm:$0xff pattern:$0x75316420]  ;;  %v401_v34 = vld.sshfl [vmem:[#allocation1 + $0x28] sm:$0xff pattern:$0x75316420] }
  0xf3   : > { %v402_v36 = vld.sshfl [vmem:[#allocation1 + $0x30] sm:$0xff pattern:$0x75316420]  ;;  %v403_v38 = vld.sshfl [vmem:[#allocation1 + $0x38] sm:$0xff pattern:$0x75316420] }
  0xf4   : > { %404 = vst [vmem:[#allocation1] ss:$2 sm:$0xff] %v1535_v32  ;;  %v472_v40 = vsel %vm268_vm0, %v396_v24, 0.0  ;;  %v473_v41 = vsel %vm268_vm0, %v397_v27, 0.0  ;;  %v475_v44 = vsel %vm268_vm0, %v398_v30, 0.0  ;;  %v477_v46 = vsel %vm268_vm0, %v399_v31, 0.0 }
  0xf5   : > { %405 = vst [vmem:[#allocation1 + $0x10] ss:$2 sm:$0xff] %v1537_v35  ;;  %v474_v43 = vadd.f32 %v473_v41, %v472_v40  ;;  %v479_v53 = vsel %vm268_vm0, %v400_v33, 0.0  ;;  %v481_v58 = vsel %vm268_vm0, %v401_v34, 0.0  ;;  %v483_v59 = vsel %vm268_vm0, %v402_v36, 0.0 }
  0xf6   : > { %406 = vst [vmem:[#allocation1 + $0x20] ss:$2 sm:$0xff] %v1539_v39  ;;  %v1569_v24 = vmul.f32 %v352_v60, %v352_v60  ;;  %v485_v27 = vsel %vm268_vm0, %v403_v38, 0.0  ;;  %v353_v33 = vsub.f32 %v1464_v48, %v1505_v11  ;;  %v354_v36 = vsub.f32 %v1468_v50, %v1505_v11 }
  0xf7   : > { %407 = vst [vmem:[#allocation1 + $0x30] ss:$2 sm:$0xff] %v1544_v42  ;;  %v476_v45 = vadd.f32 %v475_v44, %v474_v43  ;;  %v355_v38 = vsub.f32 %v1471_v51, %v1505_v11 }
  0xf8   : > { %v1587_v52 = vmul.f32 %v353_v33, %v353_v33 }
  0xf9   : > { %v478_v49 = vadd.f32 %v477_v46, %v476_v45  ;;  %v356_v45 = vsub.f32 %v1475_v55, %v1505_v11  ;;  %v1591_v60 = vmul.f32 %v355_v38, %v355_v38 }
  0xfb   : > { %v408_v56 = vld.sshfl [vmem:[#allocation1] sm:$0xff pattern:$0x75316420]  ;;  %v480_v57 = vadd.f32 %v479_v53, %v478_v49  ;;  %v409_v61 = vld.sshfl [vmem:[#allocation1 + $0x8] sm:$0xff pattern:$0x75316420]  ;;  %v1595_v11 = vmul.f32 %v356_v45, %v356_v45 }
  0xfc   : > { %v410_v62 = vld.sshfl [vmem:[#allocation1 + $0x10] sm:$0xff pattern:$0x75316420]  ;;  %v411_v7 = vld.sshfl [vmem:[#allocation1 + $0x18] sm:$0xff pattern:$0x75316420] }
  0xfd   : > { %v412_v10 = vld.sshfl [vmem:[#allocation1 + $0x20] sm:$0xff pattern:$0x75316420]  ;;  %v482_v12 = vadd.f32 %v481_v58, %v480_v57  ;;  %v413_v15 = vld.sshfl [vmem:[#allocation1 + $0x28] sm:$0xff pattern:$0x75316420] }
  0xfe   : > { %v414_v16 = vld.sshfl [vmem:[#allocation1 + $0x30] sm:$0xff pattern:$0x75316420]  ;;  %v415_v22 = vld.sshfl [vmem:[#allocation1 + $0x38] sm:$0xff pattern:$0x75316420] }
  0xff   : > { %416 = vst [vmem:[#allocation1] ss:$2 sm:$0xff] %v1562_v63  ;;  %v484_v23 = vadd.f32 %v483_v59, %v482_v12  ;;  %v487_v30 = vsel %vm268_vm0, %v408_v56, 0.0  ;;  %v489_v34 = vsel %vm268_vm0, %v409_v61, 0.0  ;;  %v491_v43 = vsel %vm268_vm0, %v410_v62, 0.0 }
 0x100   : > { %417 = vst [vmem:[#allocation1 + $0x10] ss:$2 sm:$0xff] %v1564_v14  ;;  %v493_v44 = vsel %vm268_vm0, %v411_v7, 0.0  ;;  %v1589_v56 = vmul.f32 %v354_v36, %v354_v36  ;;  %v495_v62 = vsel %vm268_vm0, %v412_v10, 0.0  ;;  %v497_v12 = vsel %vm268_vm0, %v413_v15, 0.0 }
 0x101   : > { %418 = vst [vmem:[#allocation1 + $0x20] ss:$2 sm:$0xff] %v1566_v21  ;;  %v486_v29 = vadd.f32 %v485_v27, %v484_v23  ;;  %v499_v27 = vsel %vm268_vm0, %v414_v16, 0.0 }
 0x102   : > { %419 = vst [vmem:[#allocation1 + $0x30] ss:$2 sm:$0xff] %v1569_v24 }
 0x103   : > { %v488_v31 = vadd.f32 %v487_v30, %v486_v29  ;;  %v501_v30 = vsel %vm268_vm0, %v415_v22, 0.0 }
 0x105   : > { %v490_v40 = vadd.f32 %v489_v34, %v488_v31 }
 0x106   : > { %v420_v41 = vld.sshfl [vmem:[#allocation1] sm:$0xff pattern:$0x75316420]  ;;  %v421_v46 = vld.sshfl [vmem:[#allocation1 + $0x8] sm:$0xff pattern:$0x75316420] }
 0x107   : > { %v422_v47 = vld.sshfl [vmem:[#allocation1 + $0x10] sm:$0xff pattern:$0x75316420]  ;;  %v492_v49 = vadd.f32 %v491_v43, %v490_v40  ;;  %v423_v53 = vld.sshfl [vmem:[#allocation1 + $0x18] sm:$0xff pattern:$0x75316420] }
 0x108   : > { %v424_v54 = vld.sshfl [vmem:[#allocation1 + $0x20] sm:$0xff pattern:$0x75316420]  ;;  %v425_v57 = vld.sshfl [vmem:[#allocation1 + $0x28] sm:$0xff pattern:$0x75316420] }
 0x109   : > { %v426_v58 = vld.sshfl [vmem:[#allocation1 + $0x30] sm:$0xff pattern:$0x75316420]  ;;  %v494_v59 = vadd.f32 %v493_v44, %v492_v49  ;;  %v427_v61 = vld.sshfl [vmem:[#allocation1 + $0x38] sm:$0xff pattern:$0x75316420] }
 0x10a   : > { %428 = vst [vmem:[#allocation1] ss:$2 sm:$0xff] %v1587_v52  ;;  %v503_v10 = vsel %vm268_vm0, %v420_v41, 0.0  ;;  %v505_v34 = vsel %vm268_vm0, %v421_v46, 0.0  ;;  %v507_v40 = vsel %vm268_vm0, %v422_v47, 0.0  ;;  %v509_v15 = vsel %vm268_vm0, %v423_v53, 0.0 }
 0x10b   : > { %429 = vst [vmem:[#allocation1 + $0x10] ss:$2 sm:$0xff] %v1589_v56  ;;  %v496_v7 = vadd.f32 %v495_v62, %v494_v59  ;;  %v511_v44 = vsel %vm268_vm0, %v424_v54, 0.0  ;;  %v513_v16 = vsel %vm268_vm0, %v425_v57, 0.0  ;;  %v515_v22 = vsel %vm268_vm0, %v426_v58, 0.0 }
 0x10c   : > { %430 = vst [vmem:[#allocation1 + $0x20] ss:$2 sm:$0xff] %v1591_v60  ;;  %v517_v62 = vsel %vm268_vm0, %v427_v61, 0.0 }
 0x10d   : > { %431 = vst [vmem:[#allocation1 + $0x30] ss:$2 sm:$0xff] %v1595_v11  ;;  %v498_v23 = vadd.f32 %v497_v12, %v496_v7 }
 0x10f   : > { %v500_v29 = vadd.f32 %v499_v27, %v498_v23 }
 0x111   : > { %v502_v31 = vadd.f32 %v501_v30, %v500_v29  ;;  %v432_v59 = vld.sshfl [vmem:[#allocation1] sm:$0xff pattern:$0x75316420]  ;;  %v433_v46 = vld.sshfl [vmem:[#allocation1 + $0x8] sm:$0xff pattern:$0x75316420] }
 0x112   : > { %v519_v47 = vsel %vm268_vm0, %v432_v59, 0.0  ;;  %v434_v12 = vld.sshfl [vmem:[#allocation1 + $0x10] sm:$0xff pattern:$0x75316420]  ;;  %v521_v53 = vsel %vm268_vm0, %v433_v46, 0.0 }
 0x113   : > { %v504_v33 = vadd.f32 %v503_v10, %v502_v31  ;;  %v435_v27 = vld.sshfl [vmem:[#allocation1 + $0x18] sm:$0xff pattern:$0x75316420]  ;;  %v523_v29 = vsel %vm268_vm0, %v434_v12, 0.0 }
 0x114   : > { %v436_v57 = vld.sshfl [vmem:[#allocation1 + $0x20] sm:$0xff pattern:$0x75316420]  ;;  %v525_v58 = vsel %vm268_vm0, %v435_v27, 0.0 }
 0x115   : > { %v506_v36 = vadd.f32 %v505_v34, %v504_v33  ;;  %v437_v31 = vld.sshfl [vmem:[#allocation1 + $0x28] sm:$0xff pattern:$0x75316420]  ;;  %v527_v61 = vsel %vm268_vm0, %v436_v57, 0.0 }
 0x116   : > { %v438_v33 = vld.sshfl [vmem:[#allocation1 + $0x30] sm:$0xff pattern:$0x75316420] }
 0x117   : > { %v508_v38 = vadd.f32 %v507_v40, %v506_v36  ;;  %v529_v36 = vsel %vm268_vm0, %v437_v31, 0.0  ;;  %v439_v40 = vld.sshfl [vmem:[#allocation1 + $0x38] sm:$0xff pattern:$0x75316420] }
 0x119   : > { %v510_v43 = vadd.f32 %v509_v15, %v508_v38  ;;  %v531_v15 = vsel %vm268_vm0, %v438_v33, 0.0 }
 0x11b   : > { %v512_v45 = vadd.f32 %v511_v44, %v510_v43  ;;  %v533_v44 = vsel %vm268_vm0, %v439_v40, 0.0 }
 0x11d   : > { %v514_v49 = vadd.f32 %v513_v16, %v512_v45 }
 0x11f   : > { %v516_v41 = vadd.f32 %v515_v22, %v514_v49 }
 0x121   : > { %v518_v7 = vadd.f32 %v517_v62, %v516_v41 }
 0x123   : > { %v520_v23 = vadd.f32 %v519_v47, %v518_v7 }
 0x125   : > { %v522_v54 = vadd.f32 %v521_v53, %v520_v23 }
 0x127   : > { %v524_v30 = vadd.f32 %v523_v29, %v522_v54 }
 0x129   : > { %v526_v10 = vadd.f32 %v525_v58, %v524_v30 }
 0x12b   : > { %v528_v34 = vadd.f32 %v527_v61, %v526_v10 }
 0x12d   : > { %v530_v38 = vadd.f32 %v529_v36, %v528_v34 }
 0x12f   : > { %v532_v43 = vadd.f32 %v531_v15, %v530_v38 }
 0x131   : > { %v534_v45 = vadd.f32 %v533_v44, %v532_v43 }
 0x133   : > { %535 = vadd.xlane.f32.xlu0 %v534_v45 }
 0x1a6   : > { %v536_v16 = vpop.xlane.xlu0 %535 }
 0x1a7   : > { %v537_v49 = vmul.f32 0.00024420026, %v536_v16 }
 0x1a9   : > { %v538_v22 = vadd.f32 0.0001, %v537_v49 }
 0x1ab   : > { %v539_v59 = vmul.f32 4.0, %v538_v22 }
 0x1ad   : > { %1127 = vrcp.f32 %v539_v59  ;;  %v551_v7 = vand.u32 2147483648, %v539_v59  ;;  %v549_v12 = vand.u32 2147483647, %v539_v59  ;;  %vm545_vm2 = vweird.f32 %v539_v59 }
 0x1af   : > { %v552_v53 = vor.u32 1.1754944e-38, %v551_v7  ;;  %vm550_vm4 = vcmp.eq.f32.partialorder %v549_v12, 8.507059e+37 }
 0x1b3   : > { %v1128_v41 = vpop.eup %1127 }
 0x1b4   : > { %v541_v62 = vmul.f32 %v1128_v41, %v539_v59  ;;  %vm546_vm1 = vweird.f32 %v1128_v41 }
 0x1b5   : > { %vm547_vm3 = vmor %vm545_vm2, %vm546_vm1 }
 0x1b6   : > { %v542_v46 = vsub.f32 1.0, %v541_v62 }
 0x1b8   : > { %v543_v47 = vmul.f32 %v1128_v41, %v542_v46 }
 0x1ba   : > { %v544_v23 = vadd.f32 %v1128_v41, %v543_v47 }
 0x1bc   : > { %v548_v27 = vsel %vm547_vm3, %v1128_v41, %v544_v23 }
 0x1bd   : > { %v553_v54 = vsel %vm550_vm4, %v552_v53, %v548_v27 }
 0x1be   : > { %v1621_v29 = vperm.slane %v553_v54, %v338_v6 }
 0x1c0   : > { %v560_v57 = vmul.f32 %v1621_v29, %v1515_v17  ;;  %v561_v30 = vmul.f32 %v1621_v29, %v1517_v18  ;;  %v562_v58 = vmul.f32 %v1621_v29, %v1519_v19  ;;  %v563_v31 = vmul.f32 %v1621_v29, %v1521_v20 }
 0x1c1   : > { %v564_v10 = vmul.f32 %v1621_v29, %v1535_v32  ;;  %v565_v5 = vmul.f32 %v1621_v29, %v1537_v35  ;;  %v566_v17 = vmul.f32 %v1621_v29, %v1539_v39  ;;  %v567_v18 = vmul.f32 %v1621_v29, %v1544_v42 }
 0x1c2   : > { %v576_v6 = vadd.f32 0.5, %v560_v57  ;;  %v577_v61 = vadd.f32 0.5, %v561_v30  ;;  %v578_v33 = vadd.f32 0.5, %v562_v58  ;;  %v579_v34 = vadd.f32 0.5, %v563_v31 }
 0x1c3   : > { %v568_v19 = vmul.f32 %v1621_v29, %v1562_v63  ;;  %v580_v20 = vadd.f32 0.5, %v564_v10  ;;  %v569_v32 = vmul.f32 %v1621_v29, %v1564_v14  ;;  %v581_v36 = vadd.f32 0.5, %v565_v5 }
 0x1c4   : > { %v1041_v40 = vmul.f32 -1.442695, %v576_v6  ;;  %v1042_v35 = vmul.f32 -1.442695, %v577_v61  ;;  %v570_v38 = vmul.f32 %v1621_v29, %v1566_v21  ;;  %v582_v15 = vadd.f32 0.5, %v566_v17 }
 0x1c5   : > { %v1043_v39 = vmul.f32 -1.442695, %v578_v33  ;;  %v571_v43 = vmul.f32 %v1621_v29, %v1569_v24  ;;  %v583_v42 = vadd.f32 0.5, %v567_v18  ;;  %v1044_v44 = vmul.f32 -1.442695, %v579_v34 }
 0x1c6   : > { %v572_v63 = vmul.f32 %v1621_v29, %v1587_v52  ;;  %v584_v45 = vadd.f32 0.5, %v568_v19  ;;  %1129 = vpow2.f32 %v1041_v40  ;;  %v1045_v16 = vmul.f32 -1.442695, %v580_v20 }
 0x1c7   : > { %v573_v14 = vmul.f32 %v1621_v29, %v1589_v56  ;;  %v585_v49 = vadd.f32 0.5, %v569_v32  ;;  %1131 = vpow2.f32 %v1042_v35  ;;  %v1046_v22 = vmul.f32 -1.442695, %v581_v36 }
 0x1c8   : > { %v574_v21 = vmul.f32 %v1621_v29, %v1591_v60  ;;  %v586_v59 = vadd.f32 0.5, %v570_v38  ;;  %1133 = vpow2.f32 %v1043_v39  ;;  %v1047_v24 = vmul.f32 -1.442695, %v582_v15 }
 0x1c9   : > { %v587_v41 = vadd.f32 0.5, %v571_v43  ;;  %1135 = vpow2.f32 %v1044_v44  ;;  %v1048_v62 = vmul.f32 -1.442695, %v583_v42  ;;  %v588_v46 = vadd.f32 0.5, %v572_v63 }
 0x1ca   : > { %1137 = vpow2.f32 %v1045_v16  ;;  %v1049_v52 = vmul.f32 -1.442695, %v584_v45  ;;  %v589_v7 = vadd.f32 0.5, %v573_v14  ;;  %v1050_v47 = vmul.f32 -1.442695, %v585_v49 }
 0x1cb   : > { %1139 = vpow2.f32 %v1046_v22  ;;  %v590_v56 = vadd.f32 0.5, %v574_v21  ;;  %v1051_v23 = vmul.f32 -1.442695, %v586_v59  ;;  %v1052_v27 = vmul.f32 -1.442695, %v587_v41 }
 0x1cc   : > { %v1130_v12 = vpop.eup %1129  ;;  %1141 = vpow2.f32 %v1047_v24  ;;  %v1053_v54 = vmul.f32 -1.442695, %v588_v46  ;;  %v1054_v30 = vmul.f32 -1.442695, %v589_v7  ;;  %v575_v5 = vmul.f32 %v1621_v29, %v1595_v11 }
 0x1cd   : > { %v1132_v53 = vpop.eup %1131  ;;  %1143 = vpow2.f32 %v1048_v62  ;;  %v1055_v31 = vmul.f32 -1.442695, %v590_v56  ;;  %v1655_v6 = vadd.f32 1.0, %v1130_v12 }
 0x1ce   : > { %v1134_v60 = vpop.eup %1133  ;;  %1145 = vpow2.f32 %v1049_v52  ;;  %v1657_v17 = vadd.f32 1.0, %v1132_v53  ;;  %v591_v32 = vadd.f32 0.5, %v575_v5 }
 0x1cf   : > { %v1136_v57 = vpop.eup %1135  ;;  %1147 = vpow2.f32 %v1050_v47  ;;  %v1659_v18 = vadd.f32 1.0, %v1134_v60  ;;  %v667_v38 = vand.u32 2147483648, %v1655_v6  ;;  %v665_v45 = vand.u32 2147483647, %v1655_v6 }
 0x1d0   : > { %v1138_v58 = vpop.eup %1137  ;;  %1149 = vpow2.f32 %v1051_v23  ;;  %v1661_v19 = vadd.f32 1.0, %v1136_v57  ;;  %v682_v39 = vand.u32 2147483648, %v1657_v17  ;;  %v1056_v42 = vmul.f32 -1.442695, %v591_v32 }
 0x1d1   : > { %v1140_v10 = vpop.eup %1139  ;;  %1151 = vpow2.f32 %v1052_v27  ;;  %v1663_v36 = vadd.f32 1.0, %v1138_v58  ;;  %v1680_v16 = vor.u32 1.1754944e-38, %v667_v38  ;;  %v680_v14 = vand.u32 2147483647, %v1657_v17 }
 0x1d2   : > { %v1142_v61 = vpop.eup %1141  ;;  %1153 = vpow2.f32 %v1053_v54  ;;  %v1666_v29 = vadd.f32 1.0, %v1140_v10  ;;  %v1690_v59 = vor.u32 1.1754944e-38, %v682_v39  ;;  %v697_v24 = vand.u32 2147483648, %v1659_v18 }
 0x1d3   : > { %v1144_v33 = vpop.eup %1143  ;;  %1155 = vpow2.f32 %v1054_v30  ;;  %v1669_v35 = vadd.f32 1.0, %v1142_v61  ;;  %v695_v46 = vand.u32 2147483647, %v1659_v18  ;;  %v712_v52 = vand.u32 2147483648, %v1661_v19 }
 0x1d4   : > { %v1146_v34 = vpop.eup %1145  ;;  %1157 = vpow2.f32 %v1055_v31  ;;  %v1686_v22 = vadd.f32 1.0, %v1144_v33  ;;  %v710_v23 = vand.u32 2147483647, %v1661_v19  ;;  %vm661_vm5 = vweird.f32 %v1655_v6 }
 0x1d5   : > { %v1148_v20 = vpop.eup %1147  ;;  %1159 = vrcp.f32 %v1655_v6  ;;  %v1701_v47 = vadd.f32 1.0, %v1146_v34  ;;  %vm676_vm6 = vweird.f32 %v1657_v17  ;;  %v1720_v10 = vor.u32 1.1754944e-38, %v697_v24 }
 0x1d6   : > { %v1150_v11 = vpop.eup %1149  ;;  %1161 = vrcp.f32 %v1657_v17  ;;  %v1703_v12 = vadd.f32 1.0, %v1148_v20  ;;  %vm691_vm7 = vweird.f32 %v1659_v18  ;;  %v1729_v20 = vor.u32 1.1754944e-38, %v712_v52 }
 0x1d7   : > { %v1152_v40 = vpop.eup %1151  ;;  %1163 = vrcp.f32 %v1659_v18  ;;  %v1710_v27 = vadd.f32 1.0, %v1150_v11  ;;  %vm706_vm8 = vweird.f32 %v1661_v19  ;;  %v727_v38 = vand.u32 2147483648, %v1663_v36 }
 0x1d8   : > { %v1154_v15 = vpop.eup %1153  ;;  %1165 = vrcp.f32 %v1661_v19  ;;  %v1717_v58 = vadd.f32 1.0, %v1152_v40  ;;  %v725_v40 = vand.u32 2147483647, %v1663_v36  ;;  %vm1748_vm12 = vcmp.eq.f32.partialorder %v665_v45, 8.507059e+37 }
 0x1d9   : > { %v1156_v43 = vpop.eup %1155  ;;  %1167 = vrcp.f32 %v1663_v36  ;;  %v1726_v33 = vadd.f32 1.0, %v1154_v15  ;;  %vm1752_vm13 = vcmp.eq.f32.partialorder %v680_v14, 8.507059e+37  ;;  %vm1762_vm15 = vcmp.eq.f32.partialorder %v695_v46, 8.507059e+37 }
 0x1da   : > { %v1158_v44 = vpop.eup %1157  ;;  %1169 = vrcp.f32 %v1666_v29  ;;  %v728_v45 = vor.u32 1.1754944e-38, %v727_v38  ;;  %vm1770_vm1 = vcmp.eq.f32.partialorder %v710_v23, 8.507059e+37  ;;  %vm1774_vm2 = vcmp.eq.f32.partialorder %v725_v40, 8.507059e+37 }
 0x1db   : > { %v1677_v63 = vpop.eup %1159  ;;  %1171 = vrcp.f32 %v1669_v35  ;;  %v1743_v52 = vadd.f32 1.0, %v1158_v44  ;;  %v742_v23 = vand.u32 2147483648, %v1666_v29 }
 0x1dc   : > { %v1684_v49 = vpop.eup %1161  ;;  %v657_v21 = vmul.f32 %v1677_v63, %v1655_v6  ;;  %1173 = vpow2.f32 %v1056_v42  ;;  %v1738_v42 = vadd.f32 1.0, %v1156_v43  ;;  %vm662_vm11 = vweird.f32 %v1677_v63 }
 0x1dd   : > { %v1693_v41 = vpop.eup %1163  ;;  %v672_v62 = vmul.f32 %v1684_v49, %v1657_v17  ;;  %vm677_vm14 = vweird.f32 %v1684_v49  ;;  %vm1783_vm3 = vmor %vm661_vm5, %vm662_vm11  ;;  %1175 = vrcp.f32 %v1686_v22 }
 0x1de   : > { %v1699_v7 = vpop.eup %1165  ;;  %v687_v56 = vmul.f32 %v1693_v41, %v1659_v18  ;;  %v658_v60 = vsub.f32 1.0, %v657_v21  ;;  %vm692_vm0 = vweird.f32 %v1693_v41  ;;  %vm1795_vm10 = vmor %vm676_vm6, %vm677_vm14  ;;  %1177 = vrcp.f32 %v1701_v47 }
 0x1df   : > { %v1708_v53 = vpop.eup %1167  ;;  %v673_v54 = vsub.f32 1.0, %v672_v62  ;;  %v702_v57 = vmul.f32 %v1699_v7, %v1661_v19  ;;  %vm707_vm4 = vweird.f32 %v1699_v7  ;;  %vm1808_vm9 = vmor %vm691_vm7, %vm692_vm0  ;;  %vm2231_vm0 = vweird.f32 %v1663_v36 }
 0x1e0   : > { %v1715_v30 = vpop.eup %1169  ;;  %v688_v31 = vsub.f32 1.0, %v687_v56  ;;  %v717_v5 = vmul.f32 %v1708_v53, %v1663_v36  ;;  %v659_v21 = vmul.f32 %v1677_v63, %v658_v60  ;;  %vm722_vm5 = vweird.f32 %v1708_v53  ;;  %vm1826_vm7 = vmor %vm706_vm8, %vm707_vm4 }
 0x1e1   : > { %v1724_v61 = vpop.eup %1171  ;;  %v703_v34 = vsub.f32 1.0, %v702_v57  ;;  %v732_v32 = vmul.f32 %v1715_v30, %v1666_v29  ;;  %v674_v24 = vmul.f32 %v1684_v49, %v673_v54  ;;  %v740_v54 = vand.u32 2147483647, %v1666_v29 }
 0x1e2   : > { %v718_v11 = vsub.f32 1.0, %v717_v5  ;;  %v747_v39 = vmul.f32 %v1724_v61, %v1669_v35  ;;  %v1174_v15 = vpop.eup %1173  ;;  %v689_v56 = vmul.f32 %v1693_v41, %v688_v31  ;;  %vm737_vm6 = vweird.f32 %v1715_v30 }
 0x1e3   : > { %v733_v62 = vsub.f32 1.0, %v732_v32  ;;  %v704_v60 = vmul.f32 %v1699_v7, %v703_v34  ;;  %v1759_v31 = vadd.f32 1.0, %v1174_v15  ;;  %v675_v55 = vadd.f32 %v1684_v49, %v674_v24 }
 0x1e4   : > { %v748_v57 = vsub.f32 1.0, %v747_v39  ;;  %v719_v44 = vmul.f32 %v1708_v53, %v718_v11  ;;  %v660_v39 = vadd.f32 %v1677_v63, %v659_v21  ;;  %v690_v15 = vadd.f32 %v1693_v41, %v689_v56 }
 0x1e5   : > { %v734_v14 = vmul.f32 %v1715_v30, %v733_v62  ;;  %v705_v6 = vadd.f32 %v1699_v7, %v704_v60  ;;  %vm1802_vm11 = vcmp.eq.f32.partialorder %v740_v54, 8.507059e+37  ;;  %v755_v56 = vand.u32 2147483647, %v1669_v35 }
 0x1e6   : > { %v749_v46 = vmul.f32 %v1724_v61, %v748_v57  ;;  %v720_v21 = vadd.f32 %v1708_v53, %v719_v44  ;;  %v664_v57 = vsel %vm1783_vm3, %v1677_v63, %v660_v39  ;;  %v679_v18 = vsel %vm1795_vm10, %v1684_v49, %v675_v55  ;;  %vm1837_vm3 = vmor %vm2231_vm0, %vm722_vm5 }
 0x1e7   : > { %v735_v17 = vadd.f32 %v1715_v30, %v734_v14  ;;  %vm752_vm14 = vweird.f32 %v1724_v61  ;;  %v694_v63 = vsel %vm1808_vm9, %v1693_v41, %v690_v15  ;;  %vm751_vm10 = vweird.f32 %v1669_v35 }
 0x1e8   : > { %v750_v44 = vadd.f32 %v1724_v61, %v749_v46  ;;  %v757_v19 = vand.u32 2147483648, %v1669_v35  ;;  %1179 = vrcp.f32 %v1703_v12  ;;  %v709_v49 = vsel %vm1826_vm7, %v1699_v7, %v705_v6  ;;  %v1859_v35 = vpop.eup %1175  ;;  %vm1876_vm4 = vmor %vm751_vm10, %vm752_vm14 }
 0x1e9   : > { %v724_v41 = vsel %vm1837_vm3, %v1708_v53, %v720_v21  ;;  %vm2234_vm8 = vweird.f32 %v1666_v29  ;;  %v743_v54 = vor.u32 1.1754944e-38, %v742_v23  ;;  %1181 = vrcp.f32 %v1710_v27  ;;  %v1895_v43 = vpop.eup %1177 }
 0x1ea   : > { %vm1854_vm9 = vmor %vm2234_vm8, %vm737_vm6  ;;  %v1864_v7 = vsel %vm1748_vm12, %v1680_v16, %v664_v57  ;;  %v1869_v53 = vsel %vm1752_vm13, %v1690_v59, %v679_v18  ;;  %vm1880_vm5 = vcmp.eq.f32.partialorder %v755_v56, 8.507059e+37  ;;  %v1887_v16 = vsel %vm1762_vm15, %v1720_v10, %v694_v63 }
 0x1eb   : > { %v739_v29 = vsel %vm1854_vm9, %v1715_v30, %v735_v17  ;;  %v754_v59 = vsel %vm1876_vm4, %v1724_v61, %v750_v44  ;;  %v762_v30 = vmul.f32 %v1859_v35, %v1686_v22  ;;  %v772_v5 = vand.u32 2147483648, %v1686_v22 }
 0x1ec   : > { %v1900_v46 = vsel %vm1770_vm1, %v1729_v20, %v709_v49  ;;  %v1904_v10 = vsel %vm1774_vm2, %v728_v45, %v724_v41  ;;  %v758_v32 = vor.u32 1.1754944e-38, %v757_v19  ;;  %1183 = vrcp.f32 %v1717_v58 }
 0x1ed   : > { %v1909_v61 = vsel %vm1802_vm11, %v743_v54, %v739_v29  ;;  %v763_v38 = vsub.f32 1.0, %v762_v30  ;;  %vm766_vm12 = vweird.f32 %v1686_v22  ;;  %v770_v15 = vand.u32 2147483647, %v1686_v22 }
 0x1ee   : > { %v777_v20 = vmul.f32 %v1895_v43, %v1701_v47  ;;  %v1915_v34 = vpop.eup %1179  ;;  %v1919_v45 = vsel %vm1880_vm5, %v758_v32, %v754_v59  ;;  %v785_v11 = vand.u32 2147483647, %v1701_v47  ;;  %v787_v23 = vand.u32 2147483648, %v1701_v47 }
 0x1ef   : > { %1185 = vrcp.f32 %v1726_v33  ;;  %v1924_v40 = vpop.eup %1181  ;;  %v764_v6 = vmul.f32 %v1859_v35, %v763_v38  ;;  %v773_v21 = vor.u32 1.1754944e-38, %v772_v5  ;;  %vm781_vm13 = vweird.f32 %v1701_v47 }
 0x1f0   : > { %v778_v24 = vsub.f32 1.0, %v777_v20  ;;  %v792_v62 = vmul.f32 %v1915_v34, %v1703_v12  ;;  %v800_v17 = vand.u32 2147483647, %v1703_v12  ;;  %v802_v56 = vand.u32 2147483648, %v1703_v12 }
 0x1f1   : > { %v807_v57 = vmul.f32 %v1924_v40, %v1710_v27  ;;  %v817_v18 = vand.u32 2147483648, %v1710_v27  ;;  %vm1935_vm15 = vcmp.eq.f32.partialorder %v770_v15, 8.507059e+37  ;;  %vm796_vm1 = vweird.f32 %v1703_v12 }
 0x1f2   : > { %v779_v44 = vmul.f32 %v1895_v43, %v778_v24  ;;  %v793_v63 = vsub.f32 1.0, %v792_v62  ;;  %v815_v55 = vand.u32 2147483647, %v1710_v27  ;;  %v1942_v19 = vpop.eup %1183  ;;  %v788_v49 = vor.u32 1.1754944e-38, %v787_v23 }
 0x1f3   : > { %v808_v41 = vsub.f32 1.0, %v807_v57  ;;  %vm811_vm2 = vweird.f32 %v1710_v27  ;;  %1187 = vrcp.f32 %v1738_v42  ;;  %v765_v36 = vadd.f32 %v1859_v35, %v764_v6 }
 0x1f4   : > { %vm767_vm11 = vweird.f32 %v1859_v35  ;;  %vm1948_vm6 = vcmp.eq.f32.partialorder %v785_v11, 8.507059e+37  ;;  %v794_v29 = vmul.f32 %v1915_v34, %v793_v63  ;;  %v822_v14 = vmul.f32 %v1942_v19, %v1717_v58 }
 0x1f5   : > { %v1955_v39 = vpop.eup %1185  ;;  %vm1957_vm7 = vcmp.eq.f32.partialorder %v800_v17, 8.507059e+37  ;;  %v803_v30 = vor.u32 1.1754944e-38, %v802_v56  ;;  %v809_v5 = vmul.f32 %v1924_v40, %v808_v41  ;;  %v818_v32 = vor.u32 1.1754944e-38, %v817_v18  ;;  %vm1975_vm3 = vmor %vm766_vm12, %vm767_vm11 }
 0x1f6   : > { %v832_v38 = vand.u32 2147483648, %v1717_v58  ;;  %v780_v15 = vadd.f32 %v1895_v43, %v779_v44  ;;  %vm782_vm14 = vweird.f32 %v1895_v43  ;;  %vm1965_vm0 = vcmp.eq.f32.partialorder %v815_v55, 8.507059e+37 }
 0x1f7   : > { %v823_v11 = vsub.f32 1.0, %v822_v14  ;;  %v837_v23 = vmul.f32 %v1955_v39, %v1726_v33  ;;  %v795_v24 = vadd.f32 %v1915_v34, %v794_v29  ;;  %vm797_vm10 = vweird.f32 %v1915_v34  ;;  %vm1995_vm4 = vmor %vm781_vm13, %vm782_vm14 }
 0x1f8   : > { %vm812_vm8 = vweird.f32 %v1924_v40  ;;  %v830_v62 = vand.u32 2147483647, %v1717_v58  ;;  %v769_v17 = vsel %vm1975_vm3, %v1859_v35, %v765_v36  ;;  %v810_v56 = vadd.f32 %v1924_v40, %v809_v5  ;;  %vm2011_vm12 = vmor %vm796_vm1, %vm797_vm10 }
 0x1f9   : > { %vm826_vm9 = vweird.f32 %v1717_v58  ;;  %v838_v22 = vsub.f32 1.0, %v837_v23  ;;  %v847_v57 = vand.u32 2147483648, %v1726_v33  ;;  %v1989_v18 = vpop.eup %1187  ;;  %v1999_v63 = vor.u32 1.1754944e-38, %v832_v38  ;;  %vm2028_vm13 = vmor %vm811_vm2, %vm812_vm8 }
 0x1fa   : > { %vm841_vm5 = vweird.f32 %v1726_v33  ;;  %v845_v35 = vand.u32 2147483647, %v1726_v33  ;;  %1189 = vrcp.f32 %v1743_v52  ;;  %v784_v55 = vsel %vm1995_vm4, %v1895_v43, %v780_v15 }
 0x1fb   : > { %v824_v41 = vmul.f32 %v1942_v19, %v823_v11  ;;  %v852_v36 = vmul.f32 %v1989_v18, %v1738_v42  ;;  %v860_v29 = vand.u32 2147483647, %v1738_v42  ;;  %v774_v14 = vsel %vm1935_vm15, %v773_v21, %v769_v17 }
 0x1fc   : > { %v799_v43 = vsel %vm2011_vm12, %v1915_v34, %v795_v24  ;;  %v839_v5 = vmul.f32 %v1955_v39, %v838_v22  ;;  %vm856_vm1 = vweird.f32 %v1738_v42  ;;  %v814_v21 = vsel %vm2028_vm13, %v1924_v40, %v810_v56 }
 0x1fd   : > { %vm827_vm15 = vweird.f32 %v1942_v19  ;;  %vm2038_vm11 = vcmp.eq.f32.partialorder %v830_v62, 8.507059e+37  ;;  %v848_v60 = vor.u32 1.1754944e-38, %v847_v57  ;;  %v853_v27 = vsub.f32 1.0, %v852_v36 }
 0x1fe   : > { %v789_v38 = vsel %vm1948_vm6, %v788_v49, %v784_v55  ;;  %vm842_vm2 = vweird.f32 %v1955_v39  ;;  %vm2045_vm14 = vcmp.eq.f32.partialorder %v845_v35, 8.507059e+37  ;;  %v862_v11 = vand.u32 2147483648, %v1738_v42 }
 0x1ff   : > { %1191 = vrcp.f32 %v1759_v31  ;;  %v804_v40 = vsel %vm1957_vm7, %v803_v30, %v799_v43  ;;  %v825_v23 = vadd.f32 %v1942_v19, %v824_v41  ;;  %v854_v6 = vmul.f32 %v1989_v18, %v853_v27  ;;  %vm2074_vm7 = vmor %vm826_vm9, %vm827_vm15 }
 0x200   : > { %vm2055_vm3 = vcmp.eq.f32.partialorder %v860_v29, 8.507059e+37  ;;  %v1190_v54 = vpop.eup %1189  ;;  %v819_v24 = vsel %vm1965_vm0, %v818_v32, %v814_v21  ;;  %v840_v62 = vadd.f32 %v1955_v39, %v839_v5  ;;  %v896_v17 = vmul.f32 %v1864_v7, %v1405_v0  ;;  %vm2097_vm0 = vmor %vm841_vm5, %vm842_vm2 }
 0x201   : > { %v897_v59 = vmul.f32 %v1869_v53, %v1408_v1  ;;  %v855_v30 = vadd.f32 %v1989_v18, %v854_v6  ;;  %vm857_vm6 = vweird.f32 %v1989_v18  ;;  %v867_v56 = vmul.f32 %v1190_v54, %v1743_v52 }
 0x202   : > { %v875_v22 = vand.u32 2147483647, %v1743_v52  ;;  %v877_v0 = vand.u32 2147483648, %v1743_v52  ;;  %v898_v1 = vmul.f32 %v1887_v16, %v1411_v2  ;;  %v899_v7 = vmul.f32 %v1900_v46, %v1414_v3  ;;  %912 = vst [vmem:[%s2087_s13] sm:$0xff] %v896_v17  ;;  %vm2111_vm10 = vmor %vm856_vm1, %vm857_vm6 }
 0x203   : > { %v900_v53 = vmul.f32 %v1904_v10, %v1421_v4  ;;  %v829_v58 = vsel %vm2074_vm7, %v1942_v19, %v825_v23  ;;  %v863_v3 = vor.u32 1.1754944e-38, %v862_v11  ;;  %v868_v4 = vsub.f32 1.0, %v867_v56  ;;  %913 = vst [vmem:[%s2087_s13 + $0x8] sm:$0xff] %v897_v59 }
 0x204   : > { %v901_v16 = vmul.f32 %v1909_v61, %v1424_v8  ;;  %v844_v10 = vsel %vm2097_vm0, %v1955_v39, %v840_v62  ;;  %vm871_vm8 = vweird.f32 %v1743_v52  ;;  %vm872_vm9 = vweird.f32 %v1190_v54  ;;  %914 = vst [vmem:[%s2087_s13 + $0x10] sm:$0xff] %v898_v1 }
 0x205   : > { %v1192_v46 = vpop.eup %1191  ;;  %v902_v8 = vmul.f32 %v1919_v45, %v1427_v9  ;;  %v859_v61 = vsel %vm2111_vm10, %v1989_v18, %v855_v30  ;;  %v869_v19 = vmul.f32 %v1190_v54, %v868_v4  ;;  %v903_v39 = vmul.f32 %v774_v14, %v1430_v13  ;;  %915 = vst [vmem:[%s2087_s13 + $0x18] sm:$0xff] %v899_v7  ;;  %vm873_vm5 = vmor %vm871_vm8, %vm872_vm9 }
 0x206   : > { %v882_v42 = vmul.f32 %v1192_v46, %v1759_v31  ;;  %v834_v20 = vsel %vm2038_vm11, %v1999_v63, %v829_v58  ;;  %vm2128_vm4 = vcmp.eq.f32.partialorder %v875_v22, 8.507059e+37  ;;  %v878_v9 = vor.u32 1.1754944e-38, %v877_v0  ;;  %916 = vst [vmem:[%s2087_s13 + $0x20] sm:$0xff] %v900_v53 }
 0x207   : > { %v904_v45 = vmul.f32 %v789_v38, %v1443_v25  ;;  %v849_v18 = vsel %vm2045_vm14, %v848_v60, %v844_v10  ;;  %v870_v13 = vadd.f32 %v1190_v54, %v869_v19  ;;  %v905_v35 = vmul.f32 %v804_v40, %v1446_v26  ;;  %917 = vst [vmem:[%s2087_s13 + $0x28] sm:$0xff] %v901_v16 }
 0x208   : > { %v883_v44 = vsub.f32 1.0, %v882_v42  ;;  %v864_v63 = vsel %vm2055_vm3, %v863_v3, %v859_v61  ;;  %v890_v25 = vand.u32 2147483647, %v1759_v31  ;;  %v892_v55 = vand.u32 2147483648, %v1759_v31  ;;  %918 = vst [vmem:[%s2087_s13 + $0x30] sm:$0xff] %v902_v8 }
 0x209   : > { %v906_v47 = vmul.f32 %v819_v24, %v1449_v28  ;;  %v874_v41 = vsel %vm873_vm5, %v1190_v54, %v870_v13  ;;  %vm887_vm12 = vweird.f32 %v1192_v46  ;;  %v907_v36 = vmul.f32 %v834_v20, %v1454_v37  ;;  %919 = vst [vmem:[%s2087_s13 + $0x38] sm:$0xff] %v903_v39 }
 0x20a   : > { %v884_v26 = vmul.f32 %v1192_v46, %v883_v44  ;;  %v879_v52 = vsel %vm2128_vm4, %v878_v9, %v874_v41  ;;  %v908_v29 = vmul.f32 %v849_v18, %v1464_v48  ;;  %920 = vst [vmem:[%s2087_s13 + $0x40] sm:$0xff] %v904_v45  ;;  %vm886_vm13 = vweird.f32 %v1759_v31  ;;  %v2271_v31 = vld [vmem:[#allocation8_spill] sm:$0xff] }
 0x20b   : > { %v909_v14 = vmul.f32 %v864_v63, %v1468_v50  ;;  %921 = vst [vmem:[%s2087_s13 + $0x48] sm:$0xff] %v905_v35  ;;  %vm888_vm1 = vmor %vm886_vm13, %vm887_vm12  ;;  %v893_v37 = vor.u32 1.1754944e-38, %v892_v55  ;;  %v910_v43 = vmul.f32 %v879_v52, %v1471_v51  ;;  %vm891_vm15 = vcmp.eq.f32.partialorder %v890_v25, 8.507059e+37 }
 0x20c   : > { %v885_v28 = vadd.f32 %v1192_v46, %v884_v26  ;;  %922 = vst [vmem:[%s2087_s13 + $0x50] sm:$0xff] %v906_v47 }
 0x20d   : > { %923 = vst [vmem:[%s2087_s13 + $0x58] sm:$0xff] %v907_v36 }
 0x20e   : > { %v889_v48 = vsel %vm888_vm1, %v1192_v46, %v885_v28  ;;  %924 = vst [vmem:[%s2087_s13 + $0x60] sm:$0xff] %v908_v29 }
 0x20f   : > { %v894_v12 = vsel %vm891_vm15, %v893_v37, %v889_v48  ;;  %925 = vst [vmem:[%s2087_s13 + $0x68] sm:$0xff] %v909_v14 }
 0x210   : > { %v911_v5 = vmul.f32 %v894_v12, %v2271_v31  ;;  %926 = vst [vmem:[%s2087_s13 + $0x70] sm:$0xff] %v910_v43 }
 0x212   : > { %927 = vst [vmem:[%s2087_s13 + $0x78] sm:$0xff] %v911_v5 }
 0x213   : > { %1250 = shalt.err (!%p1247_p13)
}
 0x214   : > { %1066 = dma.vmem_to_hbm [thread:$0]  (%p1369_p9), %s945_s18, 2048, %s947_s22, %s929_s23  }
 0x215 PF: > { %s958_s2 = sand.u32 1, %s1285_s6   ;;  %p1073_p0 = pnand %p1034_p12, %p1376_p11 }
 0x216   : > { %s959_s3 = scalar_lea.sflag [#allocation4], %s958_s2 }
 0x217   : > { %p1074_p1 = pneg %p1073_p0 }
 0x219   : > { %1280 = dma.done.wait (%p1074_p1), %s959_s3, 2048  }
 0x21a   : > { %1282 = vsyncadd (%p1074_p1), %s959_s3, 4294965248  ;;  %s17_s11 = sadd.s32 1, %s1305_s11   ;;  %s2272_s6 = smov %s1289_s7 }
 0x21b   : > { %p14_p2 = scmp.ge.s32.totalorder %s17_s11, 4   ;;  %s2273_s7 = smov %s1293_s8 }
 0x21c   : > { %s2274_s8 = smov %s1374_s20  ;;  %s2275_s9 = smov %s1301_s10 }
 0x21d   : > { %s2276_s10 = smov %s2278_s14  ;;  %16 = sbr.rel (!%p14_p2) target bundleno = 6 (0x6), region = 75 }
 0x222   :  { %965 = vsyncpa [#allocation3], 1 }
 0x223   :  { %967 = vsyncpa [#allocation3 + $0x1], 1 }
 0x224   :  { %968 = vsyncpa [#allocation4], 1 }
 0x225   :  { %970 = vsyncpa [#allocation4 + $0x1], 1 }

</bundles_post_ra>
